<compile_context>
chip_gen: v6e
topology: v6e:2x2x1
jax: 0.10.0
libtpu: 0.0.40
codegen_flags: <defaults>
</compile_context>

<pallas_src>
import numpy as np
import jax
import jax.numpy as jnp
from jax.experimental import pallas as pl
from jax.experimental.pallas import tpu as pltpu


def _minmax_kernel(w_ref, b_ref, x_ref, o_ref):
    # w_ref, b_ref: (1,) f32 scalars in SMEM.
    # x_ref / o_ref: (block_rows, LANES) VMEM tiles in the input's native dtype.
    # Widen to f32 in-register only; HBM traffic stays native-width.
    w = w_ref[0]
    b = b_ref[0]
    x = x_ref[...].astype(jnp.float32)
    o_ref[...] = (x * w + b).astype(o_ref.dtype)


def _round_up(a, m):
    return ((a + m - 1) // m) * m


def _minmax_pallas(x, weight, bias, *, lanes=1024, max_block_rows=512):
    """Lane-dense Pallas path.  x: (N, 1) float -> (N, 1) same dtype."""
    N, F = x.shape
    dtype = x.dtype
    itemsize = jnp.dtype(dtype).itemsize
    # Minimum sublane multiple for the block: 8 (32-bit), 16 (16-bit), 32 (8-bit).
    sublane = 8 * max(1, 4 // itemsize)

    w_flat = weight.reshape(-1).astype(jnp.float32)
    b_flat = bias.reshape(-1).astype(jnp.float32)

    total = N * F
    flat = x.reshape(-1)                              # native dtype, no copy
    rows = pl.cdiv(total, lanes)
    # Pad rows only up to the next sublane multiple (<= sublane*lanes-1 extra
    # elements, i.e. a few KiB) — NOT up to a block_rows multiple.
    rows_p = _round_up(rows, sublane)

    # Biggest tile <= max_block_rows, but split so the 1-D grid has >= 2
    # steps when possible (both v7x TensorCores get work; harmless on v5e/v6e).
    max_br = max(sublane, (max_block_rows // sublane) * sublane)
    block_rows = min(max_br, _round_up(pl.cdiv(rows_p, 2), sublane))
    grid = (pl.cdiv(rows_p, block_rows),)             # last block may be partial

    pad = rows_p * lanes - total
    if pad:
        flat = jnp.pad(flat, (0, pad))                # tiny; skipped when aligned
    x2d = flat.reshape(rows_p, lanes)

    out2d = pl.pallas_call(
        _minmax_kernel,
        out_shape=jax.ShapeDtypeStruct((rows_p, lanes), dtype),
        grid=grid,
        in_specs=[
            pl.BlockSpec(memory_space=pltpu.MemorySpace.SMEM),     # weight
            pl.BlockSpec(memory_space=pltpu.MemorySpace.SMEM),     # bias
            pl.BlockSpec((block_rows, lanes), lambda i: (i, 0)),   # x slab
        ],
        out_specs=pl.BlockSpec((block_rows, lanes), lambda i: (i, 0)),
        compiler_params=pltpu.CompilerParams(
            dimension_semantics=("parallel",)),
    )(w_flat, b_flat, x2d)

    out_flat = out2d.reshape(-1)
    if pad:
        out_flat = out_flat[:total]                   # tiny tail slice only
    return out_flat.reshape(N, F)


def preprocessing_minmax(x, weight, bias, *, min_pallas_elems=1 << 20,
                         lanes=1024, max_block_rows=512):
    """forward(x) = x @ weight.T + bias for a (1,1) weight, i.e. x*w + b."""
    N, F = x.shape
    assert F == 1 and weight.shape == (1, 1) and bias.shape == (1,)
    assert jnp.issubdtype(x.dtype, jnp.floating), \
        "PreprocessingLayerMinMax expects a floating-point input (F.linear parity)"
    if N * F < min_pallas_elems:
        # Small/medium N: launch + repack overhead would dominate the
        # memory-bound FMA.  Let XLA fuse the elementwise op directly.
        w = weight.reshape(()).astype(jnp.float32)
        b = bias.reshape(()).astype(jnp.float32)
        return (x.astype(jnp.float32) * w + b).astype(x.dtype)
    return _minmax_pallas(x, weight, bias, lanes=lanes,
                          max_block_rows=max_block_rows)


def make_minmax_params(feature_column, target_column):
    """Deterministically reproduce the module's __init__ math (no pandas).

    weight = +-1.7 / (max - min), bias = -+1.7*(min+max)/(2*(max-min)),
    sign chosen by the sign of corr(feature, target).
    """
    f = np.asarray(feature_column, dtype=np.float64)
    t = np.asarray(target_column, dtype=np.float64)
    mmax, mmin = f.max(), f.min()
    assert mmax > mmin, "constant feature column -> division by zero"
    corr = np.corrcoef(f, t)[0, 1]
    if corr >= 0:
        w = 1.7 / (mmax - mmin)
        b = -1.7 * (mmin + mmax) / (2.0 * (mmax - mmin))
    else:
        w = -1.7 / (mmax - mmin)
        b = 1.7 * (mmin + mmax) / (2.0 * (mmax - mmin))
    weight = jnp.asarray([[w]], dtype=jnp.float32)
    bias = jnp.asarray([b], dtype=jnp.float32)
    return weight, bias


if __name__ == "__main__":
    key = jax.random.PRNGKey(0)
    k_feat, k_tgt, k_x1, k_x2, k_x3 = jax.random.split(key, 5)

    # Synthetic "training data" used only to derive the deterministic
    # min/max/correlation-based scalar weight & bias (stands in for the
    # pandas-based __init__).
    n_train = 64
    feature = jax.random.uniform(k_feat, (n_train,), minval=-3.0, maxval=5.0)
    target = 2.0 * feature + 0.1 * jax.random.normal(k_tgt, (n_train,))
    weight, bias = make_minmax_params(np.array(feature), np.array(target))
    w_np = np.array(weight)[0, 0]
    b_np = np.array(bias)[0]

    # Case 1: tiny batch (8, 1) — below the cutoff, uses the fused XLA path.
    x_small = jax.random.uniform(k_x1, (8, 1), minval=-3.0, maxval=5.0,
                                 dtype=jnp.float32)
    out_small = jax.block_until_ready(
        preprocessing_minmax(x_small, weight, bias))
    ref_small = np.array(x_small) * w_np + b_np
    np.testing.assert_allclose(np.array(out_small), ref_small,
                               rtol=1e-6, atol=1e-6)

    # Case 2: force the Pallas path; N not a multiple of 1024 exercises the
    # tiny pad, the partial last block, and the tail slice.
    x_med = jax.random.uniform(k_x2, (2000, 1), minval=-3.0, maxval=5.0,
                               dtype=jnp.float32)
    out_med = jax.block_until_ready(
        preprocessing_minmax(x_med, weight, bias, min_pallas_elems=0))
    ref_med = np.array(x_med) * w_np + b_np
    np.testing.assert_allclose(np.array(out_med), ref_med,
                               rtol=1e-6, atol=1e-6)

    # Case 3: bf16 input stays bf16 through HBM (half the traffic); the
    # kernel widens to f32 in-register only.
    x_bf = jax.random.uniform(k_x3, (4096, 1), minval=-3.0,
                              maxval=5.0).astype(jnp.bfloat16)
    out_bf = jax.block_until_ready(
        preprocessing_minmax(x_bf, weight, bias, min_pallas_elems=0))
    assert out_bf.dtype == jnp.bfloat16
    ref_bf = np.array(x_bf, dtype=np.float32) * w_np + b_np
    np.testing.assert_allclose(np.array(out_bf, dtype=np.float32), ref_bf,
                               rtol=2e-2, atol=2e-2)

    print("KERNEL_OK")
</pallas_src>

<mosaic_0001>
module attributes {stable_mosaic.version = 11 : i64} {
  func.func @_minmax_kernel(%arg0: i32, %arg1: memref<1xf32, #tpu.memory_space<smem>>, %arg2: memref<1xf32, #tpu.memory_space<smem>>, %arg3: memref<8x1024xf32, #tpu.memory_space<vmem>>, %arg4: memref<8x1024xf32, #tpu.memory_space<vmem>>) attributes {dimension_semantics = [#tpu.dimension_semantics<parallel>], iteration_bounds = array<i64: 1>, scalar_prefetch = 0 : i64, scratch_operands = 0 : i64, tpu.core_type = #tpu.core_type<tc>, window_params = [{transform_indices = @transform_0, window_bounds = array<i64: 1>}, {transform_indices = @transform_1, window_bounds = array<i64: 1>}, {transform_indices = @transform_2, window_bounds = array<i64: 8, 1024>}, {transform_indices = @transform_3, window_bounds = array<i64: 8, 1024>}]} {
    %c0 = arith.constant 0 : index
    %0 = memref.load %arg1[%c0] : memref<1xf32, #tpu.memory_space<smem>>
    %c0_0 = arith.constant 0 : index
    %1 = memref.load %arg2[%c0_0] : memref<1xf32, #tpu.memory_space<smem>>
    %c0_1 = arith.constant 0 : index
    %c0_2 = arith.constant 0 : index
    %2 = vector.load %arg3[%c0_1, %c0_2] : memref<8x1024xf32, #tpu.memory_space<vmem>>, vector<8x1024xf32>
    %3 = vector.broadcast %0 : f32 to vector<8x1024xf32>
    %4 = arith.mulf %2, %3 : vector<8x1024xf32>
    %5 = vector.broadcast %1 : f32 to vector<8x1024xf32>
    %6 = arith.addf %4, %5 : vector<8x1024xf32>
    %c0_3 = arith.constant 0 : index
    %c0_4 = arith.constant 0 : index
    %7 = vector.load %arg4[%c0_3, %c0_4] : memref<8x1024xf32, #tpu.memory_space<vmem>>, vector<8x1024xf32>
    tpu.vector_store %arg4[%c0_3, %c0_4], %6 {strides = array<i32>} : memref<8x1024xf32, #tpu.memory_space<vmem>>, vector<8x1024xf32>,
    return
  }
  func.func @transform_0(%arg0: i32) -> i32 {
    %c0_i32 = arith.constant 0 : i32
    %c0_i32_0 = arith.constant 0 : i32
    return %c0_i32 : i32
  }
  func.func @transform_1(%arg0: i32) -> i32 {
    %c0_i32 = arith.constant 0 : i32
    %c0_i32_0 = arith.constant 0 : i32
    return %c0_i32 : i32
  }
  func.func @transform_2(%arg0: i32) -> (i32, i32) {
    %c0_i32 = arith.constant 0 : i32
    %c0_i32_0 = arith.constant 0 : i32
    return %arg0, %c0_i32 : i32, i32
  }
  func.func @transform_3(%arg0: i32) -> (i32, i32) {
    %c0_i32 = arith.constant 0 : i32
    %c0_i32_0 = arith.constant 0 : i32
    return %arg0, %c0_i32 : i32, i32
  }
}

</mosaic_0001>

<bundles_post_ra>
// kernel: tpu_custom_call.1
= control target key start
LH: loop header
LB: loop body
LE: loop exit
PB: predicated region body
PF: predicated region fallthrough
CT: control target
= control target key end

     0   :  { %10 = vsyncpa [#allocation5], 0  ;;  %s160_s0 = inlined_call_operand.<no memory space> [shape: f32[1], index: 0, kind: input, shape index: {}]   ;;  %s161_s1 = inlined_call_operand.<no memory space> [shape: f32[1], index: 1, kind: input, shape index: {}]   ;;  %s162_s2 = inlined_call_operand.hbm [shape: f32[8,1024], index: 2, kind: input, shape index: {}]   ;;  %s163_s3 = inlined_call_operand.hbm [shape: f32[8,1024], index: 3, kind: output, shape index: {}]  }
   0x1   :  { %11 = vsyncpa [#allocation6], 0  ;;  %s126_s12 = smov [#allocation4]  }
   0x2   :  { %s22_s13 = sshll.u32 %s126_s12, 4  ;;  %s23_s13 = int_to_ptr.vmem [resolvable:$true] %s22_s13 }
   0x3   :  { %s90_s14 = scalar_lea.vmem %s23_s13, 1024  ;;  %p95_p1 = scmp.lt.s32.totalorder %s23_s13, %s23_s13 }
   0x4   :  { %p91_p0 = scmp.ne.s32.totalorder %s23_s13, %s90_s14  ;;  %p96_p2 = scmp.lt.s32.totalorder %s90_s14, %s90_s14 }
   0x6   :  { %p97_p3 = por %p96_p2, %p95_p1 }
   0x8   :  { %p98_p4 = pnand %p97_p3, %p91_p0 }
   0xa   :  { %101 = shalt.err (!%p98_p4)
}
   0xb   :  { %25 = dma.hbm_to_vmem [thread:$0]  %s162_s2, 1024, %s23_s13, [#allocation5]  }
   0xc   :  { %122 = dma.done.wait [#allocation5], 1024  }
   0xd   :  { %123 = vsyncadd [#allocation5], 4294966272  ;;  %v39_v0 = vstv %s160_s0  ;;  %v31_v1 = vld [vmem:[#allocation4] sm:$0xff]  ;;  %v48_v2 = vstv %s161_s1  ;;  %v32_v3 = vld [vmem:[#allocation4 + $0x8] sm:$0xff]  ;;  %s127_s0 = smov [#allocation7]  }
   0xe   :  { %v33_v4 = vld [vmem:[#allocation4 + $0x10] sm:$0xff]  ;;  %v40_v5 = vmul.f32 %v39_v0, %v31_v1  ;;  %v41_v6 = vmul.f32 %v39_v0, %v32_v3  ;;  %v34_v8 = vld [vmem:[#allocation4 + $0x18] sm:$0xff]  ;;  %v35_v9 = vld [vmem:[#allocation4 + $0x20] sm:$0xff]  ;;  %s71_s2 = sshll.u32 %s127_s0, 4  ;;  %s72_s2 = int_to_ptr.vmem [resolvable:$true] %s71_s2 }
   0xf   :  { %v42_v7 = vmul.f32 %v39_v0, %v33_v4  ;;  %v36_v10 = vld [vmem:[#allocation4 + $0x28] sm:$0xff]  ;;  %v43_v11 = vmul.f32 %v39_v0, %v34_v8  ;;  %v44_v12 = vmul.f32 %v39_v0, %v35_v9  ;;  %v37_v14 = vld [vmem:[#allocation4 + $0x30] sm:$0xff]  ;;  %v38_v15 = vld [vmem:[#allocation4 + $0x38] sm:$0xff]  ;;  %s102_s1 = scalar_lea.vmem %s72_s2, 1024  ;;  %p107_p6 = scmp.lt.s32.totalorder %s72_s2, %s72_s2 }
  0x10   :  { %v45_v13 = vmul.f32 %v39_v0, %v36_v10  ;;  %v49_v16 = vadd.f32 %v48_v2, %v40_v5  ;;  %v50_v17 = vadd.f32 %v48_v2, %v41_v6  ;;  %v46_v19 = vmul.f32 %v39_v0, %v37_v14  ;;  %p103_p5 = scmp.ne.s32.totalorder %s72_s2, %s102_s1  ;;  %p108_p7 = scmp.lt.s32.totalorder %s102_s1, %s102_s1 }
  0x11   :  { %v51_v18 = vadd.f32 %v48_v2, %v42_v7  ;;  %v52_v20 = vadd.f32 %v48_v2, %v43_v11  ;;  %v53_v21 = vadd.f32 %v48_v2, %v44_v12  ;;  %v47_v23 = vmul.f32 %v39_v0, %v38_v15 }
  0x12   :  { %v54_v22 = vadd.f32 %v48_v2, %v45_v13  ;;  %57 = vst [vmem:[#allocation7] sm:$0xff] %v49_v16  ;;  %58 = vst [vmem:[#allocation7 + $0x8] sm:$0xff] %v50_v17  ;;  %v55_v24 = vadd.f32 %v48_v2, %v46_v19  ;;  %p109_p8 = por %p108_p7, %p107_p6 }
  0x13   :  { %59 = vst [vmem:[#allocation7 + $0x10] sm:$0xff] %v51_v18  ;;  %60 = vst [vmem:[#allocation7 + $0x18] sm:$0xff] %v52_v20  ;;  %v56_v25 = vadd.f32 %v48_v2, %v47_v23 }
  0x14   :  { %61 = vst [vmem:[#allocation7 + $0x20] sm:$0xff] %v53_v21  ;;  %62 = vst [vmem:[#allocation7 + $0x28] sm:$0xff] %v54_v22  ;;  %p110_p9 = pnand %p109_p8, %p103_p5 }
  0x15   :  { %63 = vst [vmem:[#allocation7 + $0x30] sm:$0xff] %v55_v24  ;;  %64 = vst [vmem:[#allocation7 + $0x38] sm:$0xff] %v56_v25 }
  0x16   :  { %113 = shalt.err (!%p110_p9)
}
  0x17   :  { %74 = dma.vmem_to_hbm [thread:$0]  %s72_s2, 1024, %s163_s3, [#allocation6]  }
  0x18   :  { %124 = dma.done.wait [#allocation6], 1024  }
  0x19   :  { %125 = vsyncadd [#allocation6], 4294966272 }
  0x1a   :  { %78 = vsyncpa [#allocation5], 1 }
  0x1b   :  { %79 = vsyncpa [#allocation6], 1 }

</bundles_post_ra>
